<compile_context>
chip_gen: v5e
topology: v5e:2x2
jax: 0.10.0
libtpu: 0.0.40
codegen_flags: <defaults>
</compile_context>

<pallas_src>
import jax
import jax.numpy as jnp
from jax.experimental import pallas as pl
from jax.experimental.pallas import tpu as pltpu

_LANES = 128        # vreg lane width (last block dim)
_SUBLANES = 8       # sublane granularity (second-to-last block dim)
_TM_TARGET = 4096   # rows per block: 4096 * 128 * 4B = 2 MiB per f32 buffer
_MIN_STEPS = 4      # keep >= ~4 grid steps so both v7x TCs get pipelined work


def _add_kernel(x_ref, y_ref, o_ref):
    # Elementwise residual add (VPU).  Promotion/casting happens here, in the
    # kernel, so the wrapper never spends an extra HBM pass on astype.
    o_ref[...] = (x_ref[...] + y_ref[...]).astype(o_ref.dtype)


def _round_up(x, m):
    return ((x + m - 1) // m) * m


def _pick_tile(rows):
    """Row-tile size: biggest block that fits comfortably in VMEM, but small
    enough that the grid has >= _MIN_STEPS steps (megacore sharding on v7x)."""
    if rows <= _MIN_STEPS * _SUBLANES:
        # Tiny array: one full-extent block (allowed even if not a multiple
        # of 8 when it equals the full array dim).
        return rows
    return min(_TM_TARGET, _round_up(pl.cdiv(rows, _MIN_STEPS), _SUBLANES))


def _lane_dense_add(x2d, y2d, out_dtype):
    """x2d + y2d for 2-D arrays of shape (rows, 128) via Pallas."""
    rows, lanes = x2d.shape
    assert lanes == _LANES
    tm = _pick_tile(rows)
    spec = pl.BlockSpec((tm, _LANES), lambda i: (i, 0))
    # In-place residual: reuse the x buffer for the output, but only when the
    # dtypes actually match (otherwise aliasing is invalid).
    aliases = {0: 0} if x2d.dtype == out_dtype else {}
    return pl.pallas_call(
        _add_kernel,
        out_shape=jax.ShapeDtypeStruct((rows, _LANES), out_dtype),
        grid=(pl.cdiv(rows, tm),),
        in_specs=[spec, spec],
        out_specs=spec,
        input_output_aliases=aliases,
        compiler_params=pltpu.CompilerParams(
            dimension_semantics=("parallel",),   # megacore sharding on v7x
            vmem_limit_bytes=32 * 1024 * 1024,   # 3 specs x 2 bufs x 2 MiB = 12 MiB
        ),
    )(x2d, y2d)


def _residual_add(x, y):
    """x + y.  Lane-dense Pallas kernel when the flattened size is a multiple
    of 128 (no masked stores, no tail copies); otherwise a plain XLA add that
    fuses into y's producer."""
    out_dtype = jnp.result_type(x.dtype, y.dtype)
    n = x.size
    if n < _LANES or n % _LANES != 0:
        return (x + y).astype(out_dtype)
    out2d = _lane_dense_add(x.reshape(-1, _LANES), y.reshape(-1, _LANES), out_dtype)
    return out2d.reshape(x.shape)


def synthetic_fn(feats, coors, w, coor_scale):
    """Deterministic stand-in for the wrapped `fn` (plain-JAX glue).
    Returns (feats_out, coors_delta) with the same shapes as (feats, coors)."""
    feats_out = jnp.tanh(feats @ w)          # (B, N, D)
    coors_delta = coors * coor_scale         # (B, N, 3)
    return feats_out, coors_delta


class Residual:
    """JAX mirror of the PyTorch Residual module."""

    def __init__(self, fn):
        self.fn = fn
        # jit the whole forward (fn + residual adds) as one compiled program.
        self._jitted = jax.jit(self._forward)

    def _forward(self, feats, coors, **kwargs):
        feats_out, coors_delta = self.fn(feats, coors, **kwargs)
        new_feats = _residual_add(feats, feats_out)   # Pallas when lane-dense
        new_coors = coors + coors_delta               # tiny: stays fused in XLA
        return new_feats, new_coors

    def __call__(self, feats, coors, **kwargs):
        return self._jitted(feats, coors, **kwargs)


if __name__ == "__main__":
    key = jax.random.PRNGKey(0)
    k_feats, k_coors, k_w = jax.random.split(key, 3)

    B, N, D = 2, 8, 32
    feats = jax.random.normal(k_feats, (B, N, D), dtype=jnp.float32)
    coors = jax.random.normal(k_coors, (B, N, 3), dtype=jnp.float32)

    # Deterministic parameters for the synthetic wrapped fn.
    w = jax.random.normal(k_w, (D, D), dtype=jnp.float32) * 0.02
    coor_scale = jnp.float32(0.1)

    module = Residual(lambda f, c: synthetic_fn(f, c, w, coor_scale))

    out_feats, out_coors = module(feats, coors)
    jax.block_until_ready((out_feats, out_coors))

    # Reference check (pure JAX) to verify semantics.
    ref_feats_out, ref_coors_delta = synthetic_fn(feats, coors, w, coor_scale)
    ref_feats = feats + ref_feats_out
    ref_coors = coors + ref_coors_delta
    assert out_feats.shape == (B, N, D) and out_coors.shape == (B, N, 3)
    assert jnp.allclose(out_feats, ref_feats, atol=1e-6)
    assert jnp.allclose(out_coors, ref_coors, atol=1e-6)

    print("KERNEL_OK")
</pallas_src>

<mosaic_0001>
module attributes {stable_mosaic.version = 11 : i64} {
  func.func @_add_kernel(%arg0: i32, %arg1: memref<4x128xf32, #tpu.memory_space<vmem>>, %arg2: memref<4x128xf32, #tpu.memory_space<vmem>>, %arg3: memref<4x128xf32, #tpu.memory_space<vmem>>) attributes {dimension_semantics = [#tpu.dimension_semantics<parallel>], iteration_bounds = array<i64: 1>, scalar_prefetch = 0 : i64, scratch_operands = 0 : i64, tpu.core_type = #tpu.core_type<tc>, window_params = [{transform_indices = @transform_0, window_bounds = array<i64: 4, 128>}, {transform_indices = @transform_1, window_bounds = array<i64: 4, 128>}, {transform_indices = @transform_2, window_bounds = array<i64: 4, 128>}]} {
    %c0 = arith.constant 0 : index
    %c0_0 = arith.constant 0 : index
    %0 = vector.load %arg1[%c0, %c0_0] : memref<4x128xf32, #tpu.memory_space<vmem>>, vector<4x128xf32>
    %c0_1 = arith.constant 0 : index
    %c0_2 = arith.constant 0 : index
    %1 = vector.load %arg2[%c0_1, %c0_2] : memref<4x128xf32, #tpu.memory_space<vmem>>, vector<4x128xf32>
    %2 = arith.addf %0, %1 : vector<4x128xf32>
    %c0_3 = arith.constant 0 : index
    %c0_4 = arith.constant 0 : index
    %3 = vector.load %arg3[%c0_3, %c0_4] : memref<4x128xf32, #tpu.memory_space<vmem>>, vector<4x128xf32>
    tpu.vector_store %arg3[%c0_3, %c0_4], %2 {strides = array<i32>} : memref<4x128xf32, #tpu.memory_space<vmem>>, vector<4x128xf32>,
    return
  }
  func.func @transform_0(%arg0: i32) -> (i32, i32) {
    %c0_i32 = arith.constant 0 : i32
    %c0_i32_0 = arith.constant 0 : i32
    return %arg0, %c0_i32 : i32, i32
  }
  func.func @transform_1(%arg0: i32) -> (i32, i32) {
    %c0_i32 = arith.constant 0 : i32
    %c0_i32_0 = arith.constant 0 : i32
    return %arg0, %c0_i32 : i32, i32
  }
  func.func @transform_2(%arg0: i32) -> (i32, i32) {
    %c0_i32 = arith.constant 0 : i32
    %c0_i32_0 = arith.constant 0 : i32
    return %arg0, %c0_i32 : i32, i32
  }
}

</mosaic_0001>

<bundles_post_ra>
// kernel: _forward.1
= control target key start
LH: loop header
LB: loop body
LE: loop exit
PB: predicated region body
PF: predicated region fallthrough
CT: control target
= control target key end

     0   :  { %s43_s0 = inlined_call_operand.vmem [shape: f32[4,128], index: 0, kind: input, shape index: {}, may-alias: {0,2}]   ;;  %s44_s1 = inlined_call_operand.vmem [shape: f32[4,128], index: 1, kind: input, shape index: {}]   ;;  %s45_s2 = inlined_call_operand.vmem [shape: f32[4,128], index: 2, kind: output, shape index: {}, may-alias: {0,2}]  }
   0x1   :  { %v11_v0 = vld [vmem:[%s43_s0] sm:$0xf] }
   0x2   :  { %v12_v1 = vld [vmem:[%s44_s1] sm:$0xf] }
   0x3   :  { %v13_v2 = vadd.f32 %v12_v1, %v11_v0 }
   0x5   :  { %14 = vst [vmem:[%s45_s2] sm:$0xf] %v13_v2 }

</bundles_post_ra>
